<compile_context>
chip_gen: v6e
topology: v6e:2x2x1
jax: 0.10.0
libtpu: 0.0.40
codegen_flags: <defaults>
</compile_context>

<pallas_src>
import functools

import jax
import jax.numpy as jnp
import numpy as np
from jax.experimental import pallas as pl
from jax.experimental.pallas import tpu as pltpu  # noqa: F401  (TPU backend)

LANE = 128  # lane-dense working width inside the kernel


# ---------------------------------------------------------------------------
# Pallas kernel: all three WeBConv layers fused (projection + propagation +
# L2 row-normalize + LeakyReLU(0.1) per layer), everything stays in VMEM.
# ---------------------------------------------------------------------------
def _global_webgnn_kernel(x_ref, w_ref, au_ref, ad_ref, o_ref, *,
                          out_chs, leaky_slope):
    """x_ref : [N, LANE]        node features, zero-padded to LANE lanes
       w_ref : [3, LANE, LANE]  per-layer fused+padded [W_up | W_down | W_bias]
       au_ref: [3, N, N]        per-layer dense "up" propagation matrices
       ad_ref: [3, N, N]        per-layer dense "down" propagation matrices
       o_ref : [N, LANE]        lane-dense output (real data in [:, :3*out_chs[-1]])
    """
    width = o_ref.shape[-1]
    col = jax.lax.broadcasted_iota(jnp.int32, (1, width), 1)
    h = x_ref[...]
    for li, oc in enumerate(out_chs):
        # One wide projection matmul:
        #   p[:, 0:oc] = up_x, p[:, oc:2oc] = down_x, p[:, 2oc:3oc] = bias_x,
        #   p[:, 3oc:] = 0 (zero-padded weights).
        p = jnp.dot(h, w_ref[li], preferred_element_type=jnp.float32)
        m_up = (col < oc).astype(jnp.float32)
        m_dn = ((col >= oc) & (col < 2 * oc)).astype(jnp.float32)
        m_bias = ((col >= 2 * oc) & (col < 3 * oc)).astype(jnp.float32)
        # "concat(x_up, x_down, bias_x)" without a concatenate: the masked
        # pieces occupy disjoint lane blocks, so their sum *is* the concat.
        agg = (jnp.dot(au_ref[li], p * m_up, preferred_element_type=jnp.float32)
               + jnp.dot(ad_ref[li], p * m_dn, preferred_element_type=jnp.float32)
               + p * m_bias)
        # F.normalize(p=2, dim=-1, eps=1e-12); padded lanes are exact zeros so
        # they do not perturb the row norm. rsqrt goes to the EUP slot.
        sq = jnp.sum(agg * agg, axis=-1, keepdims=True)
        normed = agg * jax.lax.rsqrt(jnp.maximum(sq, 1e-24))
        # Fused LeakyReLU(0.1) (act2 in GlobalWeBGNN).
        h = jnp.where(normed >= 0.0, normed, leaky_slope * normed)
    o_ref[...] = h


# ---------------------------------------------------------------------------
# Glue: dense propagation matrices for ALL layers (one scatter per direction)
# ---------------------------------------------------------------------------
def build_prop_matrices(edge_index, up_ws, down_ws, num_nodes, batch_size):
    """up_ws / down_ws: [L, num_edge] per-layer learned edge weights.
    Returns a_up, a_down: [L, N, N] with scatter-add semantics:
      a_up[l, col, row]   += (1/deg(col)) * up_w[l, e]    (messages row -> col)
      a_down[l, row, col] += (1/deg(row)) * down_w[l, e]  (flipud: col -> row)
    """
    row = edge_index[0]
    col = edge_index[1]
    up_rep = jnp.tile(up_ws, (1, batch_size))      # weight.repeat(1, batch_size)
    down_rep = jnp.tile(down_ws, (1, batch_size))
    L = up_ws.shape[0]

    deg_up = jnp.zeros((num_nodes,), jnp.float32).at[col].add(1.0)
    inv_up = jnp.where(deg_up > 0, 1.0 / deg_up, 0.0)
    a_up = jnp.zeros((L, num_nodes, num_nodes), jnp.float32)
    a_up = a_up.at[:, col, row].add(inv_up[col][None, :] * up_rep)

    deg_dn = jnp.zeros((num_nodes,), jnp.float32).at[row].add(1.0)
    inv_dn = jnp.where(deg_dn > 0, 1.0 / deg_dn, 0.0)
    a_down = jnp.zeros((L, num_nodes, num_nodes), jnp.float32)
    a_down = a_down.at[:, row, col].add(inv_dn[row][None, :] * down_rep)
    return a_up, a_down


# ---------------------------------------------------------------------------
# Forward wrapper (pads/fuses weights, builds A matrices, one pallas_call)
# ---------------------------------------------------------------------------
def global_webgnn_forward(x, edge_index, params, batch_size, *, leaky_slope=0.1):
    # TODO(synk): WeBConv.forward prints per-layer edge-weight sums; omitted (debug I/O).
    N, in_dim = x.shape
    names = ("first", "block", "last")
    out_chs = tuple(int(params[n]["W_up"].shape[1]) for n in names)
    in_chs = tuple(int(params[n]["W_up"].shape[0]) for n in names)
    assert max(in_chs) <= LANE and 3 * max(out_chs) <= LANE, \
        "channel widths must fit the lane-dense working width"

    # Fuse + zero-pad weights to lane-dense [LANE, LANE] tiles; stack per layer.
    w_stack = []
    for name in names:
        p = params[name]
        w_cat = jnp.concatenate([p["W_up"], p["W_down"], p["W_bias"]], axis=1)
        w_pad = jnp.zeros((LANE, LANE), jnp.float32)
        w_pad = w_pad.at[:w_cat.shape[0], :w_cat.shape[1]].set(w_cat)
        w_stack.append(w_pad)
    w_stack = jnp.stack(w_stack, axis=0)                       # [3, LANE, LANE]

    up_ws = jnp.stack([params[n]["up_edge_w"] for n in names], axis=0)
    down_ws = jnp.stack([params[n]["down_edge_w"] for n in names], axis=0)
    a_up, a_down = build_prop_matrices(edge_index, up_ws, down_ws, N, batch_size)

    # Lane-dense input slab (zeros beyond the real input channels).
    x_pad = jnp.zeros((N, LANE), jnp.float32).at[:, :in_dim].set(x)

    kernel = functools.partial(_global_webgnn_kernel,
                               out_chs=out_chs, leaky_slope=leaky_slope)
    out_pad = pl.pallas_call(
        kernel,
        out_shape=jax.ShapeDtypeStruct((N, LANE), jnp.float32),
    )(x_pad, w_stack, a_up, a_down)

    web_x = out_pad[:, :3 * out_chs[-1]]
    mean_up = jnp.mean(up_ws, axis=0)
    mean_down = jnp.mean(down_ws, axis=0)
    return web_x, mean_up, mean_down


# ---------------------------------------------------------------------------
# Pure-JAX reference following the original module structure
# ---------------------------------------------------------------------------
def global_webgnn_ref(x, edge_index, params, batch_size, *, leaky_slope=0.1):
    names = ("first", "block", "last")
    N = x.shape[0]
    up_ws = jnp.stack([params[n]["up_edge_w"] for n in names], axis=0)
    down_ws = jnp.stack([params[n]["down_edge_w"] for n in names], axis=0)
    a_up, a_down = build_prop_matrices(edge_index, up_ws, down_ws, N, batch_size)
    h = x
    for li, name in enumerate(names):
        p = params[name]
        up_x = jnp.dot(h, p["W_up"], preferred_element_type=jnp.float32)
        down_x = jnp.dot(h, p["W_down"], preferred_element_type=jnp.float32)
        bias_x = jnp.dot(h, p["W_bias"], preferred_element_type=jnp.float32)
        x_up = jnp.dot(a_up[li], up_x, preferred_element_type=jnp.float32)
        x_down = jnp.dot(a_down[li], down_x, preferred_element_type=jnp.float32)
        c = jnp.concatenate([x_up, x_down, bias_x], axis=-1)
        norm = jnp.maximum(jnp.sqrt(jnp.sum(c * c, axis=-1, keepdims=True)), 1e-12)
        c = c / norm
        h = jnp.where(c >= 0.0, c, leaky_slope * c)
    return h, jnp.mean(up_ws, axis=0), jnp.mean(down_ws, axis=0)


# ---------------------------------------------------------------------------
# Main
# ---------------------------------------------------------------------------
if __name__ == "__main__":
    key = jax.random.PRNGKey(0)
    keys = jax.random.split(key, 8)

    node_num, batch_size = 16, 2
    num_edge = 24
    input_dim, hidden_dim, embedding_dim = 8, 16, 8
    N = node_num * batch_size

    # One base graph, replicated per batch element with node offsets.
    src = jax.random.randint(keys[0], (num_edge,), 0, node_num)
    dst = jax.random.randint(keys[1], (num_edge,), 0, node_num)
    offsets = jnp.arange(batch_size) * node_num
    row = (src[None, :] + offsets[:, None]).reshape(-1)
    col = (dst[None, :] + offsets[:, None]).reshape(-1)
    edge_index = jnp.stack([row, col], axis=0).astype(jnp.int32)  # [2, E]

    x = jax.random.normal(keys[2], (N, input_dim), jnp.float32)

    def make_layer(k, in_ch, out_ch):
        ks = jax.random.split(k, 5)
        s = 1.0 / np.sqrt(in_ch)
        gain = np.sqrt(2.0)  # torch.nn.init.calculate_gain('relu')
        return dict(
            W_up=jax.random.uniform(ks[0], (in_ch, out_ch), jnp.float32, -s, s),
            W_down=jax.random.uniform(ks[1], (in_ch, out_ch), jnp.float32, -s, s),
            W_bias=jax.random.uniform(ks[2], (in_ch, out_ch), jnp.float32, -s, s),
            up_edge_w=jax.random.normal(ks[3], (num_edge,), jnp.float32) * gain,
            down_edge_w=jax.random.normal(ks[4], (num_edge,), jnp.float32) * gain,
        )

    params = dict(
        first=make_layer(keys[3], input_dim, hidden_dim),
        block=make_layer(keys[4], hidden_dim * 3, hidden_dim),
        last=make_layer(keys[5], hidden_dim * 3, embedding_dim),
    )

    web_x, mean_up, mean_down = global_webgnn_forward(
        x, edge_index, params, batch_size)
    jax.block_until_ready((web_x, mean_up, mean_down))

    web_x_ref, mu_ref, md_ref = global_webgnn_ref(
        x, edge_index, params, batch_size)
    np.testing.assert_allclose(np.asarray(web_x), np.asarray(web_x_ref),
                               rtol=1e-3, atol=1e-3)
    np.testing.assert_allclose(np.asarray(mean_up), np.asarray(mu_ref),
                               rtol=1e-5, atol=1e-5)
    np.testing.assert_allclose(np.asarray(mean_down), np.asarray(md_ref),
                               rtol=1e-5, atol=1e-5)
    print("KERNEL_OK")
</pallas_src>

<mosaic_0001>
module attributes {stable_mosaic.version = 11 : i64} {
  func.func @_global_webgnn_kernel(%arg0: memref<32x128xf32, #tpu.memory_space<vmem>>, %arg1: memref<3x128x128xf32, #tpu.memory_space<vmem>>, %arg2: memref<3x32x32xf32, #tpu.memory_space<vmem>>, %arg3: memref<3x32x32xf32, #tpu.memory_space<vmem>>, %arg4: memref<32x128xf32, #tpu.memory_space<vmem>>) attributes {dimension_semantics = [], scalar_prefetch = 0 : i64, scratch_operands = 0 : i64, tpu.core_type = #tpu.core_type<tc>} {
    %0 = tpu.iota {dimensions = array<i32: 1>} : vector<1x128xi32>
    %c0 = arith.constant 0 : index
    %c0_0 = arith.constant 0 : index
    %1 = vector.load %arg0[%c0, %c0_0] : memref<32x128xf32, #tpu.memory_space<vmem>>, vector<32x128xf32>
    %c0_1 = arith.constant 0 : index
    %c0_2 = arith.constant 0 : index
    %c0_3 = arith.constant 0 : index
    %2 = vector.load %arg1[%c0_1, %c0_2, %c0_3] : memref<3x128x128xf32, #tpu.memory_space<vmem>>, vector<1x128x128xf32>
    %3 = vector.shape_cast %2 : vector<1x128x128xf32> to vector<128x128xf32>
    %cst = arith.constant dense<0.000000e+00> : vector<32x128xf32>
    %4 = tpu.matmul %1, %3, %cst {dimension_numbers = #tpu.dot_dimension_numbers<[1], [0], [0], [1], [0, 0, 1, 1], [], []>} : vector<32x128xf32>, vector<128x128xf32>, vector<32x128xf32> -> vector<32x128xf32>
    %c16_i32 = arith.constant 16 : i32
    %5 = vector.broadcast %c16_i32 : i32 to vector<1x128xi32>
    %6 = arith.cmpi slt, %0, %5 : vector<1x128xi32>
    %7 = arith.extui %6 : vector<1x128xi1> to vector<1x128xi32>
    %8 = arith.sitofp %7 : vector<1x128xi32> to vector<1x128xf32>
    %c16_i32_4 = arith.constant 16 : i32
    %9 = vector.broadcast %c16_i32_4 : i32 to vector<1x128xi32>
    %10 = arith.cmpi sge, %0, %9 : vector<1x128xi32>
    %c32_i32 = arith.constant 32 : i32
    %11 = vector.broadcast %c32_i32 : i32 to vector<1x128xi32>
    %12 = arith.cmpi slt, %0, %11 : vector<1x128xi32>
    %13 = arith.andi %10, %12 : vector<1x128xi1>
    %14 = arith.extui %13 : vector<1x128xi1> to vector<1x128xi32>
    %15 = arith.sitofp %14 : vector<1x128xi32> to vector<1x128xf32>
    %c32_i32_5 = arith.constant 32 : i32
    %16 = vector.broadcast %c32_i32_5 : i32 to vector<1x128xi32>
    %17 = arith.cmpi sge, %0, %16 : vector<1x128xi32>
    %c48_i32 = arith.constant 48 : i32
    %18 = vector.broadcast %c48_i32 : i32 to vector<1x128xi32>
    %19 = arith.cmpi slt, %0, %18 : vector<1x128xi32>
    %20 = arith.andi %17, %19 : vector<1x128xi1>
    %21 = arith.extui %20 : vector<1x128xi1> to vector<1x128xi32>
    %22 = arith.sitofp %21 : vector<1x128xi32> to vector<1x128xf32>
    %c0_6 = arith.constant 0 : index
    %c0_7 = arith.constant 0 : index
    %c0_8 = arith.constant 0 : index
    %23 = vector.load %arg2[%c0_6, %c0_7, %c0_8] : memref<3x32x32xf32, #tpu.memory_space<vmem>>, vector<1x32x32xf32>
    %24 = vector.shape_cast %23 : vector<1x32x32xf32> to vector<32x32xf32>
    %25 = vector.broadcast %8 : vector<1x128xf32> to vector<32x128xf32>
    %26 = arith.mulf %4, %25 : vector<32x128xf32>
    %cst_9 = arith.constant dense<0.000000e+00> : vector<32x128xf32>
    %27 = tpu.matmul %24, %26, %cst_9 {dimension_numbers = #tpu.dot_dimension_numbers<[1], [0], [0], [1], [0, 0, 1, 1], [], []>} : vector<32x32xf32>, vector<32x128xf32>, vector<32x128xf32> -> vector<32x128xf32>
    %c0_10 = arith.constant 0 : index
    %c0_11 = arith.constant 0 : index
    %c0_12 = arith.constant 0 : index
    %28 = vector.load %arg3[%c0_10, %c0_11, %c0_12] : memref<3x32x32xf32, #tpu.memory_space<vmem>>, vector<1x32x32xf32>
    %29 = vector.shape_cast %28 : vector<1x32x32xf32> to vector<32x32xf32>
    %30 = vector.broadcast %15 : vector<1x128xf32> to vector<32x128xf32>
    %31 = arith.mulf %4, %30 : vector<32x128xf32>
    %cst_13 = arith.constant dense<0.000000e+00> : vector<32x128xf32>
    %32 = tpu.matmul %29, %31, %cst_13 {dimension_numbers = #tpu.dot_dimension_numbers<[1], [0], [0], [1], [0, 0, 1, 1], [], []>} : vector<32x32xf32>, vector<32x128xf32>, vector<32x128xf32> -> vector<32x128xf32>
    %33 = arith.addf %27, %32 : vector<32x128xf32>
    %34 = vector.broadcast %22 : vector<1x128xf32> to vector<32x128xf32>
    %35 = arith.mulf %4, %34 : vector<32x128xf32>
    %36 = arith.addf %33, %35 : vector<32x128xf32>
    %37 = arith.mulf %36, %36 : vector<32x128xf32>
    %cst_14 = arith.constant dense<0.000000e+00> : vector<32xf32>
    %38 = vector.multi_reduction <add>, %37, %cst_14 [1] : vector<32x128xf32> to vector<32xf32>
    %39 = vector.shape_cast %38 : vector<32xf32> to vector<32x1xf32>
    %cst_15 = arith.constant 1.000000e-24 : f32
    %40 = vector.broadcast %cst_15 : f32 to vector<32x1xf32>
    %41 = arith.maximumf %39, %40 : vector<32x1xf32>
    %42 = math.rsqrt %41 : vector<32x1xf32>
    %43 = vector.broadcast %42 : vector<32x1xf32> to vector<32x128xf32>
    %44 = arith.mulf %36, %43 : vector<32x128xf32>
    %cst_16 = arith.constant 0.000000e+00 : f32
    %45 = vector.broadcast %cst_16 : f32 to vector<32x128xf32>
    %46 = arith.cmpf oge, %44, %45 : vector<32x128xf32>
    %cst_17 = arith.constant 1.000000e-01 : f32
    %47 = vector.broadcast %cst_17 : f32 to vector<32x128xf32>
    %48 = arith.mulf %47, %44 : vector<32x128xf32>
    %49 = arith.select %46, %44, %48 : vector<32x128xi1>, vector<32x128xf32>
    %c1 = arith.constant 1 : index
    %c0_18 = arith.constant 0 : index
    %c0_19 = arith.constant 0 : index
    %50 = vector.load %arg1[%c1, %c0_18, %c0_19] : memref<3x128x128xf32, #tpu.memory_space<vmem>>, vector<1x128x128xf32>
    %51 = vector.shape_cast %50 : vector<1x128x128xf32> to vector<128x128xf32>
    %cst_20 = arith.constant dense<0.000000e+00> : vector<32x128xf32>
    %52 = tpu.matmul %49, %51, %cst_20 {dimension_numbers = #tpu.dot_dimension_numbers<[1], [0], [0], [1], [0, 0, 1, 1], [], []>} : vector<32x128xf32>, vector<128x128xf32>, vector<32x128xf32> -> vector<32x128xf32>
    %c16_i32_21 = arith.constant 16 : i32
    %53 = vector.broadcast %c16_i32_21 : i32 to vector<1x128xi32>
    %54 = arith.cmpi slt, %0, %53 : vector<1x128xi32>
    %55 = arith.extui %54 : vector<1x128xi1> to vector<1x128xi32>
    %56 = arith.sitofp %55 : vector<1x128xi32> to vector<1x128xf32>
    %c16_i32_22 = arith.constant 16 : i32
    %57 = vector.broadcast %c16_i32_22 : i32 to vector<1x128xi32>
    %58 = arith.cmpi sge, %0, %57 : vector<1x128xi32>
    %c32_i32_23 = arith.constant 32 : i32
    %59 = vector.broadcast %c32_i32_23 : i32 to vector<1x128xi32>
    %60 = arith.cmpi slt, %0, %59 : vector<1x128xi32>
    %61 = arith.andi %58, %60 : vector<1x128xi1>
    %62 = arith.extui %61 : vector<1x128xi1> to vector<1x128xi32>
    %63 = arith.sitofp %62 : vector<1x128xi32> to vector<1x128xf32>
    %c32_i32_24 = arith.constant 32 : i32
    %64 = vector.broadcast %c32_i32_24 : i32 to vector<1x128xi32>
    %65 = arith.cmpi sge, %0, %64 : vector<1x128xi32>
    %c48_i32_25 = arith.constant 48 : i32
    %66 = vector.broadcast %c48_i32_25 : i32 to vector<1x128xi32>
    %67 = arith.cmpi slt, %0, %66 : vector<1x128xi32>
    %68 = arith.andi %65, %67 : vector<1x128xi1>
    %69 = arith.extui %68 : vector<1x128xi1> to vector<1x128xi32>
    %70 = arith.sitofp %69 : vector<1x128xi32> to vector<1x128xf32>
    %c1_26 = arith.constant 1 : index
    %c0_27 = arith.constant 0 : index
    %c0_28 = arith.constant 0 : index
    %71 = vector.load %arg2[%c1_26, %c0_27, %c0_28] : memref<3x32x32xf32, #tpu.memory_space<vmem>>, vector<1x32x32xf32>
    %72 = vector.shape_cast %71 : vector<1x32x32xf32> to vector<32x32xf32>
    %73 = vector.broadcast %56 : vector<1x128xf32> to vector<32x128xf32>
    %74 = arith.mulf %52, %73 : vector<32x128xf32>
    %cst_29 = arith.constant dense<0.000000e+00> : vector<32x128xf32>
    %75 = tpu.matmul %72, %74, %cst_29 {dimension_numbers = #tpu.dot_dimension_numbers<[1], [0], [0], [1], [0, 0, 1, 1], [], []>} : vector<32x32xf32>, vector<32x128xf32>, vector<32x128xf32> -> vector<32x128xf32>
    %c1_30 = arith.constant 1 : index
    %c0_31 = arith.constant 0 : index
    %c0_32 = arith.constant 0 : index
    %76 = vector.load %arg3[%c1_30, %c0_31, %c0_32] : memref<3x32x32xf32, #tpu.memory_space<vmem>>, vector<1x32x32xf32>
    %77 = vector.shape_cast %76 : vector<1x32x32xf32> to vector<32x32xf32>
    %78 = vector.broadcast %63 : vector<1x128xf32> to vector<32x128xf32>
    %79 = arith.mulf %52, %78 : vector<32x128xf32>
    %cst_33 = arith.constant dense<0.000000e+00> : vector<32x128xf32>
    %80 = tpu.matmul %77, %79, %cst_33 {dimension_numbers = #tpu.dot_dimension_numbers<[1], [0], [0], [1], [0, 0, 1, 1], [], []>} : vector<32x32xf32>, vector<32x128xf32>, vector<32x128xf32> -> vector<32x128xf32>
    %81 = arith.addf %75, %80 : vector<32x128xf32>
    %82 = vector.broadcast %70 : vector<1x128xf32> to vector<32x128xf32>
    %83 = arith.mulf %52, %82 : vector<32x128xf32>
    %84 = arith.addf %81, %83 : vector<32x128xf32>
    %85 = arith.mulf %84, %84 : vector<32x128xf32>
    %cst_34 = arith.constant dense<0.000000e+00> : vector<32xf32>
    %86 = vector.multi_reduction <add>, %85, %cst_34 [1] : vector<32x128xf32> to vector<32xf32>
    %87 = vector.shape_cast %86 : vector<32xf32> to vector<32x1xf32>
    %cst_35 = arith.constant 1.000000e-24 : f32
    %88 = vector.broadcast %cst_35 : f32 to vector<32x1xf32>
    %89 = arith.maximumf %87, %88 : vector<32x1xf32>
    %90 = math.rsqrt %89 : vector<32x1xf32>
    %91 = vector.broadcast %90 : vector<32x1xf32> to vector<32x128xf32>
    %92 = arith.mulf %84, %91 : vector<32x128xf32>
    %cst_36 = arith.constant 0.000000e+00 : f32
    %93 = vector.broadcast %cst_36 : f32 to vector<32x128xf32>
    %94 = arith.cmpf oge, %92, %93 : vector<32x128xf32>
    %cst_37 = arith.constant 1.000000e-01 : f32
    %95 = vector.broadcast %cst_37 : f32 to vector<32x128xf32>
    %96 = arith.mulf %95, %92 : vector<32x128xf32>
    %97 = arith.select %94, %92, %96 : vector<32x128xi1>, vector<32x128xf32>
    %c2 = arith.constant 2 : index
    %c0_38 = arith.constant 0 : index
    %c0_39 = arith.constant 0 : index
    %98 = vector.load %arg1[%c2, %c0_38, %c0_39] : memref<3x128x128xf32, #tpu.memory_space<vmem>>, vector<1x128x128xf32>
    %99 = vector.shape_cast %98 : vector<1x128x128xf32> to vector<128x128xf32>
    %cst_40 = arith.constant dense<0.000000e+00> : vector<32x128xf32>
    %100 = tpu.matmul %97, %99, %cst_40 {dimension_numbers = #tpu.dot_dimension_numbers<[1], [0], [0], [1], [0, 0, 1, 1], [], []>} : vector<32x128xf32>, vector<128x128xf32>, vector<32x128xf32> -> vector<32x128xf32>
    %c8_i32 = arith.constant 8 : i32
    %101 = vector.broadcast %c8_i32 : i32 to vector<1x128xi32>
    %102 = arith.cmpi slt, %0, %101 : vector<1x128xi32>
    %103 = arith.extui %102 : vector<1x128xi1> to vector<1x128xi32>
    %104 = arith.sitofp %103 : vector<1x128xi32> to vector<1x128xf32>
    %c8_i32_41 = arith.constant 8 : i32
    %105 = vector.broadcast %c8_i32_41 : i32 to vector<1x128xi32>
    %106 = arith.cmpi sge, %0, %105 : vector<1x128xi32>
    %c16_i32_42 = arith.constant 16 : i32
    %107 = vector.broadcast %c16_i32_42 : i32 to vector<1x128xi32>
    %108 = arith.cmpi slt, %0, %107 : vector<1x128xi32>
    %109 = arith.andi %106, %108 : vector<1x128xi1>
    %110 = arith.extui %109 : vector<1x128xi1> to vector<1x128xi32>
    %111 = arith.sitofp %110 : vector<1x128xi32> to vector<1x128xf32>
    %c16_i32_43 = arith.constant 16 : i32
    %112 = vector.broadcast %c16_i32_43 : i32 to vector<1x128xi32>
    %113 = arith.cmpi sge, %0, %112 : vector<1x128xi32>
    %c24_i32 = arith.constant 24 : i32
    %114 = vector.broadcast %c24_i32 : i32 to vector<1x128xi32>
    %115 = arith.cmpi slt, %0, %114 : vector<1x128xi32>
    %116 = arith.andi %113, %115 : vector<1x128xi1>
    %117 = arith.extui %116 : vector<1x128xi1> to vector<1x128xi32>
    %118 = arith.sitofp %117 : vector<1x128xi32> to vector<1x128xf32>
    %c2_44 = arith.constant 2 : index
    %c0_45 = arith.constant 0 : index
    %c0_46 = arith.constant 0 : index
    %119 = vector.load %arg2[%c2_44, %c0_45, %c0_46] : memref<3x32x32xf32, #tpu.memory_space<vmem>>, vector<1x32x32xf32>
    %120 = vector.shape_cast %119 : vector<1x32x32xf32> to vector<32x32xf32>
    %121 = vector.broadcast %104 : vector<1x128xf32> to vector<32x128xf32>
    %122 = arith.mulf %100, %121 : vector<32x128xf32>
    %cst_47 = arith.constant dense<0.000000e+00> : vector<32x128xf32>
    %123 = tpu.matmul %120, %122, %cst_47 {dimension_numbers = #tpu.dot_dimension_numbers<[1], [0], [0], [1], [0, 0, 1, 1], [], []>} : vector<32x32xf32>, vector<32x128xf32>, vector<32x128xf32> -> vector<32x128xf32>
    %c2_48 = arith.constant 2 : index
    %c0_49 = arith.constant 0 : index
    %c0_50 = arith.constant 0 : index
    %124 = vector.load %arg3[%c2_48, %c0_49, %c0_50] : memref<3x32x32xf32, #tpu.memory_space<vmem>>, vector<1x32x32xf32>
    %125 = vector.shape_cast %124 : vector<1x32x32xf32> to vector<32x32xf32>
    %126 = vector.broadcast %111 : vector<1x128xf32> to vector<32x128xf32>
    %127 = arith.mulf %100, %126 : vector<32x128xf32>
    %cst_51 = arith.constant dense<0.000000e+00> : vector<32x128xf32>
    %128 = tpu.matmul %125, %127, %cst_51 {dimension_numbers = #tpu.dot_dimension_numbers<[1], [0], [0], [1], [0, 0, 1, 1], [], []>} : vector<32x32xf32>, vector<32x128xf32>, vector<32x128xf32> -> vector<32x128xf32>
    %129 = arith.addf %123, %128 : vector<32x128xf32>
    %130 = vector.broadcast %118 : vector<1x128xf32> to vector<32x128xf32>
    %131 = arith.mulf %100, %130 : vector<32x128xf32>
    %132 = arith.addf %129, %131 : vector<32x128xf32>
    %133 = arith.mulf %132, %132 : vector<32x128xf32>
    %cst_52 = arith.constant dense<0.000000e+00> : vector<32xf32>
    %134 = vector.multi_reduction <add>, %133, %cst_52 [1] : vector<32x128xf32> to vector<32xf32>
    %135 = vector.shape_cast %134 : vector<32xf32> to vector<32x1xf32>
    %cst_53 = arith.constant 1.000000e-24 : f32
    %136 = vector.broadcast %cst_53 : f32 to vector<32x1xf32>
    %137 = arith.maximumf %135, %136 : vector<32x1xf32>
    %138 = math.rsqrt %137 : vector<32x1xf32>
    %139 = vector.broadcast %138 : vector<32x1xf32> to vector<32x128xf32>
    %140 = arith.mulf %132, %139 : vector<32x128xf32>
    %cst_54 = arith.constant 0.000000e+00 : f32
    %141 = vector.broadcast %cst_54 : f32 to vector<32x128xf32>
    %142 = arith.cmpf oge, %140, %141 : vector<32x128xf32>
    %cst_55 = arith.constant 1.000000e-01 : f32
    %143 = vector.broadcast %cst_55 : f32 to vector<32x128xf32>
    %144 = arith.mulf %143, %140 : vector<32x128xf32>
    %145 = arith.select %142, %140, %144 : vector<32x128xi1>, vector<32x128xf32>
    %c0_56 = arith.constant 0 : index
    %c0_57 = arith.constant 0 : index
    %146 = vector.load %arg4[%c0_56, %c0_57] : memref<32x128xf32, #tpu.memory_space<vmem>>, vector<32x128xf32>
    tpu.vector_store %arg4[%c0_56, %c0_57], %145 {strides = array<i32>} : memref<32x128xf32, #tpu.memory_space<vmem>>, vector<32x128xf32>,
    return
  }
}

</mosaic_0001>

<bundles_post_ra>
// kernel: tpu_custom_call.1
= control target key start
LH: loop header
LB: loop body
LE: loop exit
PB: predicated region body
PF: predicated region fallthrough
CT: control target
= control target key end

     0   :  { %9 = vsyncpa [#allocation3], 0  ;;  %s1880_s0 = inlined_call_operand.hbm [shape: f32[32,128], index: 0, kind: input, shape index: {}]   ;;  %s1881_s1 = inlined_call_operand.hbm [shape: f32[3,128,128], index: 1, kind: input, shape index: {}]   ;;  %s1882_s2 = inlined_call_operand.hbm [shape: f32[3,32,32], index: 2, kind: input, shape index: {}]   ;;  %s1883_s3 = inlined_call_operand.hbm [shape: f32[3,32,32], index: 3, kind: input, shape index: {}]   ;;  %s1884_s4 = inlined_call_operand.hbm [shape: f32[32,128], index: 4, kind: output, shape index: {}]  }
   0x1   :  { %10 = vsyncpa [#allocation6], 0 }
   0x2   :  { %11 = vsyncpa [#allocation9], 0 }
   0x3   :  { %12 = vsyncpa [#allocation4], 0  ;;  %s1674_s15 = smov [#allocation5]   ;;  %s1675_s17 = smov [#allocation2]  }
   0x4   :  { %s30_s16 = sshll.u32 %s1674_s15, 4  ;;  %s18_s18 = sshll.u32 %s1675_s17, 4  ;;  %s31_s16 = int_to_ptr.vmem [resolvable:$true] %s30_s16  ;;  %s19_s18 = int_to_ptr.vmem [resolvable:$true] %s18_s18 }
   0x5   :  { %s1574_s19 = scalar_lea.vmem %s31_s16, 6144  ;;  %p1579_p1 = scmp.lt.s32.totalorder %s31_s16, %s31_s16 }
   0x6   :  { %p1575_p0 = scmp.ne.s32.totalorder %s31_s16, %s1574_s19  ;;  %p1580_p2 = scmp.lt.s32.totalorder %s1574_s19, %s1574_s19 }
   0x8   :  { %p1581_p3 = por %p1580_p2, %p1579_p1 }
   0xa   :  { %p1582_p4 = pnand %p1581_p3, %p1575_p0 }
   0xc   :  { %1585 = shalt.err (!%p1582_p4)
}
   0xd   :  { %s1676_s20 = smov 128   ;;  %s1677_s21 = smov 8  }
   0xe   :  { %36 = dma.hbm_to_vmem [thread:$0]  %s1881_s1, 6144, %s31_s16, [#allocation6], %s1676_s20, %s1676_s20, %s1677_s21  }
   0xf   :  { %s1594_s24 = scalar_lea.vmem %s19_s18, 512  ;;  %p1599_p6 = scmp.lt.s32.totalorder %s19_s18, %s19_s18 }
  0x10   :  { %p1595_p5 = scmp.ne.s32.totalorder %s19_s18, %s1594_s24  ;;  %p1600_p7 = scmp.lt.s32.totalorder %s1594_s24, %s1594_s24 }
  0x12   :  { %p1601_p8 = por %p1600_p7, %p1599_p6 }
  0x14   :  { %p1602_p9 = pnand %p1601_p8, %p1595_p5 }
  0x16   :  { %1605 = shalt.err (!%p1602_p9)
}
  0x17   :  { %24 = dma.hbm_to_vmem [thread:$0]  %s1880_s0, 512, %s19_s18, [#allocation3], %s1676_s20, %s1676_s20, %s1677_s21  }
  0x18   :  { %s1678_s27 = smov [#allocation7]   ;;  %s1679_s29 = smov [#allocation8]  }
  0x19   :  { %s42_s28 = sshll.u32 %s1678_s27, 4  ;;  %s54_s30 = sshll.u32 %s1679_s29, 4  ;;  %s43_s28 = int_to_ptr.vmem [resolvable:$true] %s42_s28  ;;  %s55_s30 = int_to_ptr.vmem [resolvable:$true] %s54_s30 }
  0x1a   :  { %s1614_s1 = scalar_lea.vmem %s43_s28, 1536  ;;  %p1619_p11 = scmp.lt.s32.totalorder %s43_s28, %s43_s28 }
  0x1b   :  { %p1615_p10 = scmp.ne.s32.totalorder %s43_s28, %s1614_s1  ;;  %p1620_p12 = scmp.lt.s32.totalorder %s1614_s1, %s1614_s1 }
  0x1d   :  { %p1621_p13 = por %p1620_p12, %p1619_p11 }
  0x1f   :  { %p1622_p0 = pnand %p1621_p13, %p1615_p10 }
  0x21   :  { %1625 = shalt.err (!%p1622_p0)
}
  0x22   :  { %48 = dma.hbm_to_vmem [thread:$0]  %s1882_s2, 1536, %s43_s28, [#allocation6], %s1676_s20, %s1676_s20, %s1677_s21  }
  0x23   :  { %s1634_s0 = scalar_lea.vmem %s55_s30, 1536  ;;  %p1639_p2 = scmp.lt.s32.totalorder %s55_s30, %s55_s30 }
  0x24   :  { %p1635_p1 = scmp.ne.s32.totalorder %s55_s30, %s1634_s0  ;;  %p1640_p3 = scmp.lt.s32.totalorder %s1634_s0, %s1634_s0 }
  0x26   :  { %p1641_p4 = por %p1640_p3, %p1639_p2 }
  0x28   :  { %p1642_p5 = pnand %p1641_p4, %p1635_p1 }
  0x2a   :  { %1645 = shalt.err (!%p1642_p5)
}
  0x2b   :  { %60 = dma.hbm_to_vmem [thread:$0]  %s1883_s3, 1536, %s55_s30, [#allocation9], %s1676_s20, %s1676_s20, %s1677_s21  }
  0x2c   :  { %1666 = dma.done.wait [#allocation3], 512  }
  0x2d   :  { %1667 = vsyncadd [#allocation3], 4294966784 }
  0x2e   :  { %1668 = dma.done.wait [#allocation6], 7680  }
  0x2f   :  { %1669 = vsyncadd [#allocation6], 4294959616 }
  0x30   :  { %1670 = dma.done.wait [#allocation9], 1536  }
  0x31   :  { %1671 = vsyncadd [#allocation9], 4294965760  ;;  %v94_v0 = vld [vmem:[#allocation5 + $0x78] sm:$0xff]  ;;  %v93_v1 = vld [vmem:[#allocation5 + $0x70] sm:$0xff]  ;;  %vm209_vm0 = vcmask 261120   ;;  %v73_v21 = vlaneseq  ;;  %v1680_v25 = vmov 0.0  }
  0x32   :  { %1336 = vmatprep.subr.mxu0 %v94_v0  ;;  %v92_v2 = vld [vmem:[#allocation5 + $0x68] sm:$0xff]  ;;  %v91_v3 = vld [vmem:[#allocation5 + $0x60] sm:$0xff]  ;;  %v90_v5 = vld [vmem:[#allocation5 + $0x58] sm:$0xff]  ;;  %s1681_s2 = smov [#allocation10]  }
  0x33   :  { %1337 = vmatpush3.msra.mxu0 %v94_v0  ;;  %v75_v4 = vld [vmem:[#allocation2] sm:$0xff]  ;;  %v89_v6 = vld [vmem:[#allocation5 + $0x50] sm:$0xff]  ;;  %v88_v7 = vld [vmem:[#allocation5 + $0x48] sm:$0xff]  ;;  %v1732_v22 = vand.u32 127, %v73_v21  ;;  %s1184_s3 = sshll.u32 %s1681_s2, 4  ;;  %s1185_s3 = int_to_ptr.vmem [resolvable:$true] %s1184_s3 }
  0x34   :  { %1338 = vmatprep.subr.mxu0 %v93_v1  ;;  %1368 = vmatprep.mubr.f32.mxu0 %v75_v4  ;;  %v87_v8 = vld [vmem:[#allocation5 + $0x40] sm:$0xff]  ;;  %v86_v9 = vld [vmem:[#allocation5 + $0x38] sm:$0xff]  ;;  %v85_v10 = vld [vmem:[#allocation5 + $0x30] sm:$0xff]  ;;  %s1646_s9 = scalar_lea.vmem %s1185_s3, 512  ;;  %p1651_p7 = scmp.lt.s32.totalorder %s1185_s3, %s1185_s3 }
  0x35   :  { %1339 = vmatpush3.msra.mxu0 %v93_v1  ;;  %v84_v11 = vld [vmem:[#allocation5 + $0x28] sm:$0xff]  ;;  %v83_v12 = vld [vmem:[#allocation5 + $0x20] sm:$0xff]  ;;  %v82_v13 = vld [vmem:[#allocation5 + $0x18] sm:$0xff]  ;;  %vm183_vm1 = vcmp.ge.s32.totalorder %v1732_v22, 16  ;;  %vm184_vm2 = vcmp.lt.s32.totalorder %v1732_v22, 32  ;;  %vm180_vm4 = vcmp.lt.s32.totalorder %v1732_v22, 16  ;;  %p1647_p6 = scmp.ne.s32.totalorder %s1185_s3, %s1646_s9  ;;  %p1652_p8 = scmp.lt.s32.totalorder %s1646_s9, %s1646_s9 }
  0x36   :  { %1340 = vmatprep.subr.mxu0 %v92_v2  ;;  %v81_v14 = vld [vmem:[#allocation5 + $0x10] sm:$0xff]  ;;  %v80_v15 = vld [vmem:[#allocation5 + $0x8] sm:$0xff]  ;;  %v79_v16 = vld [vmem:[#allocation5] sm:$0xff]  ;;  %v1761_v33 = vsel %vm180_vm4, 1.0, %v1680_v25  ;;  %vm188_vm5 = vcmp.ge.s32.totalorder %v1732_v22, 32  ;;  %vm189_vm6 = vcmp.lt.s32.totalorder %v1732_v22, 48 }
  0x37   :  { %1341 = vmatpush3.msra.mxu0 %v92_v2  ;;  %v76_v17 = vld [vmem:[#allocation2 + $0x8] sm:$0xff]  ;;  %v77_v18 = vld [vmem:[#allocation2 + $0x10] sm:$0xff]  ;;  %v78_v19 = vld [vmem:[#allocation2 + $0x18] sm:$0xff]  ;;  %p1653_p9 = por %p1652_p8, %p1651_p7 }
  0x38   :  { %1342 = vmatprep.subr.mxu0 %v91_v3  ;;  %v201_v20 = vld [vmem:[#allocation8] sm:$0xff]  ;;  %vm185_vm3 = vmand %vm183_vm1, %vm184_vm2  ;;  %v202_v34 = vld [vmem:[#allocation8 + $0x8] sm:$0xff]  ;;  %vm911_vm2 = vcmp.ge.s32.totalorder %v1732_v22, 8 }
  0x39   :  { %1343 = vmatpush3.msra.mxu0 %v91_v3  ;;  %1382 = vmatprep.mubr.msk.f32.mxu1 %vm209_vm0, %v201_v20  ;;  %v1743_v26 = vsel %vm185_vm3, 1.0, %v1680_v25  ;;  %v203_v36 = vld [vmem:[#allocation8 + $0x10] sm:$0xff]  ;;  %v204_v38 = vld [vmem:[#allocation8 + $0x18] sm:$0xff]  ;;  %v193_v40 = vld [vmem:[#allocation7] sm:$0xff]  ;;  %p1654_p10 = pnand %p1653_p9, %p1647_p6 }
  0x3a   :  { %1344 = vmatprep.subr.mxu0 %v90_v5  ;;  %v194_v42 = vld [vmem:[#allocation7 + $0x8] sm:$0xff]  ;;  %v195_v43 = vld [vmem:[#allocation7 + $0x10] sm:$0xff]  ;;  %v196_v44 = vld [vmem:[#allocation7 + $0x18] sm:$0xff] }
  0x3b   :  { %1345 = vmatpush3.msra.mxu0 %v90_v5  ;;  %v464_v45 = vld [vmem:[#allocation5 + $0xf8] sm:$0xff]  ;;  %v463_v46 = vld [vmem:[#allocation5 + $0xf0] sm:$0xff]  ;;  %v462_v47 = vld [vmem:[#allocation5 + $0xe8] sm:$0xff] }
  0x3c   :  { %1346 = vmatprep.subr.mxu0 %v89_v6  ;;  %v461_v48 = vld [vmem:[#allocation5 + $0xe0] sm:$0xff]  ;;  %vm190_vm7 = vmand %vm188_vm5, %vm189_vm6  ;;  %v450_v20 = vld [vmem:[#allocation5 + $0x88] sm:$0xff]  ;;  %vm908_vm5 = vcmp.lt.s32.totalorder %v1732_v22, 8 }
  0x3d   :  { %1347 = vmatpush3.msra.mxu0 %v89_v6  ;;  %v1781_v54 = vsel %vm190_vm7, 1.0, %v1680_v25  ;;  %v449_v21 = vld [vmem:[#allocation5 + $0x80] sm:$0xff]  ;;  %vm912_vm3 = vmand %vm911_vm2, %vm180_vm4  ;;  %vm915_vm4 = vcmp.lt.s32.totalorder %v1732_v22, 24 }
  0x3e   :  { %1348 = vmatprep.subr.mxu0 %v88_v7  ;;  %vm916_vm6 = vmand %vm183_vm1, %vm915_vm4 }
  0x3f   :  { %1349 = vmatpush3.msra.mxu0 %v88_v7 }
  0x40   :  { %1350 = vmatprep.subr.mxu0 %v87_v8 }
  0x41   :  { %1351 = vmatpush3.msra.mxu0 %v87_v8 }
  0x42   :  { %1352 = vmatprep.subr.mxu0 %v86_v9 }
  0x43   :  { %1353 = vmatpush3.msra.mxu0 %v86_v9 }
  0x44   :  { %1354 = vmatprep.subr.mxu0 %v85_v10 }
  0x45   :  { %1355 = vmatpush3.msra.mxu0 %v85_v10  ;;  %v460_v10 = vld [vmem:[#allocation5 + $0xd8] sm:$0xff] }
  0x46   :  { %1356 = vmatprep.subr.mxu0 %v84_v11 }
  0x47   :  { %1357 = vmatpush3.msra.mxu0 %v84_v11  ;;  %v459_v11 = vld [vmem:[#allocation5 + $0xd0] sm:$0xff] }
  0x48   :  { %1358 = vmatprep.subr.mxu0 %v83_v12 }
  0x49   :  { %1359 = vmatpush3.msra.mxu0 %v83_v12  ;;  %v458_v12 = vld [vmem:[#allocation5 + $0xc8] sm:$0xff] }
  0x4a   :  { %1360 = vmatprep.subr.mxu0 %v82_v13 }
  0x4b   :  { %1361 = vmatpush3.msra.mxu0 %v82_v13  ;;  %v457_v13 = vld [vmem:[#allocation5 + $0xc0] sm:$0xff] }
  0x4c   :  { %1362 = vmatprep.subr.mxu0 %v81_v14 }
  0x4d   :  { %1363 = vmatpush3.msra.mxu0 %v81_v14  ;;  %v456_v14 = vld [vmem:[#allocation5 + $0xb8] sm:$0xff] }
  0x4e   :  { %1364 = vmatprep.subr.mxu0 %v80_v15 }
  0x4f   :  { %1365 = vmatpush3.msra.mxu0 %v80_v15  ;;  %v455_v15 = vld [vmem:[#allocation5 + $0xb0] sm:$0xff] }
  0x50   :  { %1366 = vmatprep.subr.mxu0 %v79_v16 }
  0x51   :  { %1367 = vmatpush3.msra.mxu0 %v79_v16  ;;  %v454_v16 = vld [vmem:[#allocation5 + $0xa8] sm:$0xff] }
  0x52   :  { %1369 = vmatmul.mubr.f32.vlgmr.msra.gmra.mxu0 %v76_v17  ;;  %v453_v17 = vld [vmem:[#allocation5 + $0xa0] sm:$0xff] }
  0x53   :  { %1371 = vmatprep.mubr.f32.mxu0 %v77_v18  ;;  %v452_v18 = vld [vmem:[#allocation5 + $0x98] sm:$0xff] }
  0x56   :  { %1372 = vmatmul.mubr.f32.gmra.mxu0 %v78_v19  ;;  %v451_v19 = vld [vmem:[#allocation5 + $0x90] sm:$0xff] }
 0x112   :  { %v1736_v23 = vpop.f32.mrf.mxu0 }
 0x113   :  { %v206_v31 = vmul.f32 %v1736_v23, %v1743_v26  ;;  %v198_v39 = vmul.f32 %v1736_v23, %v1761_v33  ;;  %v405_v60 = vmul.f32 %v1736_v23, %v1781_v54 }
 0x114   :  { %v1740_v24 = vpop.f32.mrf.mxu0 }
 0x115   :  { %v205_v32 = vmul.f32 %v1743_v26, %v1740_v24  ;;  %v197_v41 = vmul.f32 %v1761_v33, %v1740_v24  ;;  %v404_v56 = vmul.f32 %v1781_v54, %v1740_v24 }
 0x116   :  { %v1745_v27 = vpop.f32.mrf.mxu0 }
 0x117   :  { %v208_v28 = vmul.f32 %v1745_v27, %v1743_v26  ;;  %v200_v35 = vmul.f32 %v1745_v27, %v1761_v33  ;;  %v407_v4 = vmul.f32 %v1745_v27, %v1781_v54 }
 0x118   :  { %v1749_v29 = vpop.f32.mrf.mxu0 }
 0x119   :  { %v207_v30 = vmul.f32 %v1743_v26, %v1749_v29  ;;  %1374 = vmatprep.subr.mxu1 %v208_v28  ;;  %v199_v37 = vmul.f32 %v1761_v33, %v1749_v29  ;;  %v406_v62 = vmul.f32 %v1781_v54, %v1749_v29 }
 0x11a   :  { %1375 = vmatpush3.msra.mxu1 %v208_v28 }
 0x11b   :  { %1376 = vmatprep.subr.mxu1 %v207_v30 }
 0x11c   :  { %1377 = vmatpush3.msra.mxu1 %v207_v30 }
 0x11d   :  { %1378 = vmatprep.subr.mxu1 %v206_v31 }
 0x11e   :  { %1379 = vmatpush3.msra.mxu1 %v206_v31 }
 0x11f   :  { %1380 = vmatprep.subr.mxu1 %v205_v32 }
 0x120   :  { %1381 = vmatpush3.msra.mxu1 %v205_v32 }
 0x121   :  { %1383 = vmatmul.mubr.msk.f32.vlgmr.msra.gmra.mxu1 %vm209_vm0, %v202_v34  ;;  %1388 = vmatprep.subr.mxu1 %v200_v35 }
 0x122   :  { %1389 = vmatpush3.msra.mxu1 %v200_v35  ;;  %1385 = vmatprep.mubr.msk.f32.mxu1 %vm209_vm0, %v203_v36 }
 0x123   :  { %1390 = vmatprep.subr.mxu1 %v199_v37 }
 0x124   :  { %1391 = vmatpush3.msra.mxu1 %v199_v37 }
 0x125   :  { %1386 = vmatmul.mubr.msk.f32.gmra.mxu1 %vm209_vm0, %v204_v38  ;;  %1392 = vmatprep.subr.mxu1 %v198_v39 }
 0x126   :  { %1393 = vmatpush3.msra.mxu1 %v198_v39  ;;  %1396 = vmatprep.mubr.msk.f32.mxu1 %vm209_vm0, %v193_v40 }
 0x127   :  { %1394 = vmatprep.subr.mxu1 %v197_v41 }
 0x128   :  { %1395 = vmatpush3.msra.mxu1 %v197_v41 }
 0x129   :  { %1397 = vmatmul.mubr.msk.f32.vlgmr.msra.gmra.mxu1 %vm209_vm0, %v194_v42  ;;  %1402 = vmatprep.subr.mxu1 %v464_v45 }
 0x12a   :  { %1399 = vmatprep.mubr.msk.f32.mxu1 %vm209_vm0, %v195_v43  ;;  %1403 = vmatpush3.msra.mxu1 %v464_v45 }
 0x12b   :  { %1404 = vmatprep.subr.mxu1 %v463_v46 }
 0x12c   :  { %1405 = vmatpush3.msra.mxu1 %v463_v46 }
 0x12d   :  { %1400 = vmatmul.mubr.msk.f32.gmra.mxu1 %vm209_vm0, %v196_v44  ;;  %1406 = vmatprep.subr.mxu1 %v462_v47 }
 0x12e   :  { %1407 = vmatpush3.msra.mxu1 %v462_v47 }
 0x12f   :  { %1408 = vmatprep.subr.mxu1 %v461_v48 }
 0x130   :  { %1409 = vmatpush3.msra.mxu1 %v461_v48 }
 0x131   :  { %1410 = vmatprep.subr.mxu1 %v460_v10 }
 0x132   :  { %1411 = vmatpush3.msra.mxu1 %v460_v10 }
 0x133   :  { %1412 = vmatprep.subr.mxu1 %v459_v11 }
 0x134   :  { %1413 = vmatpush3.msra.mxu1 %v459_v11 }
 0x135   :  { %1414 = vmatprep.subr.mxu1 %v458_v12 }
 0x136   :  { %1415 = vmatpush3.msra.mxu1 %v458_v12 }
 0x137   :  { %1416 = vmatprep.subr.mxu1 %v457_v13 }
 0x138   :  { %1417 = vmatpush3.msra.mxu1 %v457_v13 }
 0x139   :  { %1418 = vmatprep.subr.mxu1 %v456_v14 }
 0x13a   :  { %1419 = vmatpush3.msra.mxu1 %v456_v14 }
 0x13b   :  { %1420 = vmatprep.subr.mxu1 %v455_v15 }
 0x13c   :  { %1421 = vmatpush3.msra.mxu1 %v455_v15 }
 0x13d   :  { %1422 = vmatprep.subr.mxu1 %v454_v16 }
 0x13e   :  { %1423 = vmatpush3.msra.mxu1 %v454_v16 }
 0x13f   :  { %1424 = vmatprep.subr.mxu1 %v453_v17 }
 0x140   :  { %1425 = vmatpush3.msra.mxu1 %v453_v17 }
 0x141   :  { %1426 = vmatprep.subr.mxu1 %v452_v18 }
 0x142   :  { %1427 = vmatpush3.msra.mxu1 %v452_v18 }
 0x143   :  { %1428 = vmatprep.subr.mxu1 %v451_v19 }
 0x144   :  { %1429 = vmatpush3.msra.mxu1 %v451_v19 }
 0x145   :  { %1430 = vmatprep.subr.mxu1 %v450_v20 }
 0x146   :  { %1431 = vmatpush3.msra.mxu1 %v450_v20 }
 0x147   :  { %1432 = vmatprep.subr.mxu1 %v449_v21 }
 0x148   :  { %1433 = vmatpush3.msra.mxu1 %v449_v21 }
 0x1e1   :  { %v1384_v49 = vpop.f32.mrf.mxu1 }
 0x1e3   :  { %v288_v50 = vpop.f32.mrf.mxu1 }
 0x1e5   :  { %v1387_v51 = vpop.f32.mrf.mxu1 }
 0x1e7   :  { %v298_v52 = vpop.f32.mrf.mxu1 }
 0x1e9   :  { %v1398_v53 = vpop.f32.mrf.mxu1 }
 0x1ea   :  { %v391_v57 = vadd.f32 %v1398_v53, %v1384_v49 }
 0x1eb   :  { %v385_v55 = vpop.f32.mrf.mxu1 }
 0x1ec   :  { %v386_v58 = vadd.f32 %v385_v55, %v288_v50  ;;  %v1791_v0 = vadd.f32 %v405_v60, %v391_v57  ;;  %v560_v50 = vld [vmem:[#allocation8 + $0x20] sm:$0xff] }
 0x1ed   :  { %v1401_v59 = vpop.f32.mrf.mxu1 }
 0x1ee   :  { %v1787_v61 = vadd.f32 %v404_v56, %v386_v58  ;;  %v401_v1 = vadd.f32 %v1401_v59, %v1387_v51  ;;  %v413_v8 = vmul.f32 %v1791_v0, %v1791_v0  ;;  %v551_v51 = vld [vmem:[#allocation7 + $0x20] sm:$0xff] }
 0x1ef   :  { %v395_v63 = vpop.f32.mrf.mxu1  ;;  %1462 = vmatprep.mubr.msk.f32.mxu0 %vm209_vm0, %v551_v51 }
 0x1f0   :  { %v396_v2 = vadd.f32 %v395_v63, %v298_v52  ;;  %v412_v3 = vmul.f32 %v1787_v61, %v1787_v61  ;;  %v1799_v6 = vadd.f32 %v407_v4, %v401_v1  ;;  %v561_v1 = vld [vmem:[#allocation8 + $0x28] sm:$0xff]  ;;  %v553_v4 = vld [vmem:[#allocation7 + $0x30] sm:$0xff] }
 0x1f2   :  { %416 = vadd.xlane.f32.xlu0 %v412_v3  ;;  %v1797_v5 = vadd.f32 %v406_v62, %v396_v2  ;;  %v415_v9 = vmul.f32 %v1799_v6, %v1799_v6  ;;  %v552_v2 = vld [vmem:[#allocation7 + $0x28] sm:$0xff]  ;;  %v562_v3 = vld [vmem:[#allocation8 + $0x30] sm:$0xff] }
 0x1f4   :  { %v414_v7 = vmul.f32 %v1797_v5, %v1797_v5 }
 0x1f6   :  { %420 = vadd.xlane.f32.xlu1 %v414_v7  ;;  %418 = vadd.xlane.f32.xlu0 %v413_v8  ;;  %v820_v7 = vld [vmem:[#allocation5 + $0x168] sm:$0xff]  ;;  %v819_v8 = vld [vmem:[#allocation5 + $0x160] sm:$0xff] }
 0x1fa   :  { %422 = vadd.xlane.f32.xlu1 %v415_v9 }
 0x27b   :  { %v417_v23 = vpop.xlane.xlu0 %416 }
 0x27c   :  { %v424_v24 = vmax.f32 %v417_v23, 1e-24 }
 0x27e   :  { %1542 = vrsqrt.f32 %v424_v24 }
 0x27f   :  { %v421_v27 = vpop.xlane.xlu1 %420  ;;  %v419_v28 = vpop.xlane.xlu0 %418 }
 0x280   :  { %v426_v29 = vmax.f32 %v421_v27, 1e-24  ;;  %v425_v30 = vmax.f32 %v419_v28, 1e-24 }
 0x282   :  { %1544 = vrsqrt.f32 %v426_v29 }
 0x283   :  { %1546 = vrsqrt.f32 %v425_v30  ;;  %v423_v31 = vpop.xlane.xlu1 %422 }
 0x284   :  { %v427_v32 = vmax.f32 %v423_v31, 1e-24 }
 0x286   :  { %1548 = vrsqrt.f32 %v427_v32 }
 0x28b   :  { %v1543_v34 = vpop.eup %1542 }
 0x28c   :  { %v432_v35 = vmul.f32 %v1543_v34, %v1787_v61 }
 0x28e   :  { %vm436_vm8 = vcmp.ge.f32.partialorder %v432_v35, 0.0  ;;  %v440_v36 = vmul.f32 0.1, %v432_v35 }
 0x28f   :  { %v1545_v37 = vpop.eup %1544 }
 0x290   :  { %v1547_v38 = vpop.eup %1546  ;;  %v444_v39 = vsel %vm436_vm8, %v432_v35, %v440_v36  ;;  %v434_v40 = vmul.f32 %v1545_v37, %v1797_v5  ;;  %v822_v5 = vld [vmem:[#allocation5 + $0x178] sm:$0xff] }
 0x291   :  { %1434 = vmatprep.mubr.f32.mxu1 %v444_v39  ;;  %v433_v41 = vmul.f32 %v1547_v38, %v1791_v0  ;;  %v818_v37 = vld [vmem:[#allocation5 + $0x158] sm:$0xff]  ;;  %v816_v38 = vld [vmem:[#allocation5 + $0x148] sm:$0xff]  ;;  %v815_v39 = vld [vmem:[#allocation5 + $0x140] sm:$0xff] }
 0x292   :  { %vm438_vm9 = vcmp.ge.f32.partialorder %v434_v40, 0.0  ;;  %v442_v42 = vmul.f32 0.1, %v434_v40 }
 0x293   :  { %v1549_v43 = vpop.eup %1548  ;;  %vm437_vm10 = vcmp.ge.f32.partialorder %v433_v41, 0.0  ;;  %v441_v44 = vmul.f32 0.1, %v433_v41 }
 0x294   :  { %v446_v45 = vsel %vm438_vm9, %v434_v40, %v442_v42  ;;  %v435_v46 = vmul.f32 %v1549_v43, %v1799_v6  ;;  %v821_v6 = vld [vmem:[#allocation5 + $0x170] sm:$0xff]  ;;  %v814_v40 = vld [vmem:[#allocation5 + $0x138] sm:$0xff]  ;;  %v812_v42 = vld [vmem:[#allocation5 + $0x128] sm:$0xff] }
 0x295   :  { %v445_v47 = vsel %vm437_vm10, %v433_v41, %v441_v44  ;;  %v813_v41 = vld [vmem:[#allocation5 + $0x130] sm:$0xff]  ;;  %v811_v43 = vld [vmem:[#allocation5 + $0x120] sm:$0xff]  ;;  %v810_v44 = vld [vmem:[#allocation5 + $0x118] sm:$0xff] }
 0x296   :  { %1435 = vmatmul.mubr.f32.vlgmr.msra.gmra.mxu1 %v445_v47  ;;  %vm439_vm11 = vcmp.ge.f32.partialorder %v435_v46, 0.0  ;;  %v443_v48 = vmul.f32 0.1, %v435_v46  ;;  %v807_v47 = vld [vmem:[#allocation5 + $0x100] sm:$0xff] }
 0x297   :  { %1437 = vmatprep.mubr.f32.mxu1 %v446_v45  ;;  %v809_v45 = vld [vmem:[#allocation5 + $0x110] sm:$0xff] }
 0x298   :  { %v447_v49 = vsel %vm439_vm11, %v435_v46, %v443_v48  ;;  %v808_v46 = vld [vmem:[#allocation5 + $0x108] sm:$0xff] }
 0x29a   :  { %1438 = vmatmul.mubr.f32.gmra.mxu1 %v447_v49 }
 0x29b   :  { %1448 = vmatprep.mubr.msk.f32.mxu1 %vm209_vm0, %v560_v50 }
 0x356   :  { %v1436_v52 = vpop.f32.mrf.mxu1 }
 0x357   :  { %v556_v61 = vmul.f32 %v1436_v52, %v1761_v33  ;;  %v565_v62 = vmul.f32 %v1436_v52, %v1743_v26  ;;  %v763_v11 = vmul.f32 %v1436_v52, %v1781_v54 }
 0x358   :  { %v531_v53 = vpop.f32.mrf.mxu1 }
 0x359   :  { %v555_v63 = vmul.f32 %v1761_v33, %v531_v53  ;;  %v564_v0 = vmul.f32 %v1743_v26, %v531_v53  ;;  %v762_v15 = vmul.f32 %v1781_v54, %v531_v53 }
 0x35a   :  { %v1439_v55 = vpop.f32.mrf.mxu1 }
 0x35b   :  { %v558_v56 = vmul.f32 %v1439_v55, %v1761_v33  ;;  %v567_v57 = vmul.f32 %v1439_v55, %v1743_v26  ;;  %v765_v20 = vmul.f32 %v1439_v55, %v1781_v54 }
 0x35c   :  { %v1815_v58 = vpop.f32.mrf.mxu1 }
 0x35d   :  { %v557_v59 = vmul.f32 %v1761_v33, %v1815_v58  ;;  %v566_v60 = vmul.f32 %v1743_v26, %v1815_v58  ;;  %1440 = vmatprep.subr.mxu1 %v567_v57  ;;  %1454 = vmatprep.subr.mxu0 %v558_v56  ;;  %v563_v26 = vld [vmem:[#allocation8 + $0x38] sm:$0xff]  ;;  %v764_v29 = vmul.f32 %v1781_v54, %v1815_v58  ;;  %v817_v54 = vld [vmem:[#allocation5 + $0x150] sm:$0xff] }
 0x35e   :  { %1441 = vmatpush3.msra.mxu1 %v567_v57  ;;  %1455 = vmatpush3.msra.mxu0 %v558_v56  ;;  %v554_v33 = vld [vmem:[#allocation7 + $0x38] sm:$0xff] }
 0x35f   :  { %1442 = vmatprep.subr.mxu1 %v566_v60  ;;  %1456 = vmatprep.subr.mxu0 %v557_v59 }
 0x360   :  { %1443 = vmatpush3.msra.mxu1 %v566_v60  ;;  %1457 = vmatpush3.msra.mxu0 %v557_v59 }
 0x361   :  { %1444 = vmatprep.subr.mxu1 %v565_v62  ;;  %1458 = vmatprep.subr.mxu0 %v556_v61 }
 0x362   :  { %1445 = vmatpush3.msra.mxu1 %v565_v62  ;;  %1459 = vmatpush3.msra.mxu0 %v556_v61 }
 0x363   :  { %1446 = vmatprep.subr.mxu1 %v564_v0  ;;  %1460 = vmatprep.subr.mxu0 %v555_v63 }
 0x364   :  { %1447 = vmatpush3.msra.mxu1 %v564_v0  ;;  %1461 = vmatpush3.msra.mxu0 %v555_v63 }
 0x365   :  { %1449 = vmatmul.mubr.msk.f32.vlgmr.msra.gmra.mxu1 %vm209_vm0, %v561_v1  ;;  %1463 = vmatmul.mubr.msk.f32.vlgmr.msra.gmra.mxu0 %vm209_vm0, %v552_v2 }
 0x366   :  { %1451 = vmatprep.mubr.msk.f32.mxu1 %vm209_vm0, %v562_v3  ;;  %1465 = vmatprep.mubr.msk.f32.mxu0 %vm209_vm0, %v553_v4 }
 0x367   :  { %1468 = vmatprep.subr.mxu0 %v822_v5 }
 0x368   :  { %1469 = vmatpush3.msra.mxu0 %v822_v5 }
 0x369   :  { %1452 = vmatmul.mubr.msk.f32.gmra.mxu1 %vm209_vm0, %v563_v26  ;;  %1466 = vmatmul.mubr.msk.f32.gmra.mxu0 %vm209_vm0, %v554_v33 }
 0x36a   :  { %1470 = vmatprep.subr.mxu0 %v821_v6 }
 0x36b   :  { %1471 = vmatpush3.msra.mxu0 %v821_v6 }
 0x36c   :  { %1472 = vmatprep.subr.mxu0 %v820_v7 }
 0x36d   :  { %1473 = vmatpush3.msra.mxu0 %v820_v7  ;;  %v929_v7 = vld [vmem:[#allocation8 + $0x40] sm:$0xff] }
 0x36e   :  { %1474 = vmatprep.subr.mxu0 %v819_v8  ;;  %1514 = vmatprep.mubr.msk.f32.mxu1 %vm209_vm0, %v929_v7 }
 0x36f   :  { %1475 = vmatpush3.msra.mxu0 %v819_v8 }
 0x370   :  { %1476 = vmatprep.subr.mxu0 %v818_v37 }
 0x371   :  { %1477 = vmatpush3.msra.mxu0 %v818_v37 }
 0x372   :  { %1478 = vmatprep.subr.mxu0 %v817_v54 }
 0x373   :  { %1479 = vmatpush3.msra.mxu0 %v817_v54 }
 0x374   :  { %1480 = vmatprep.subr.mxu0 %v816_v38 }
 0x375   :  { %1481 = vmatpush3.msra.mxu0 %v816_v38 }
 0x376   :  { %1482 = vmatprep.subr.mxu0 %v815_v39 }
 0x377   :  { %1483 = vmatpush3.msra.mxu0 %v815_v39 }
 0x378   :  { %1484 = vmatprep.subr.mxu0 %v814_v40 }
 0x379   :  { %1485 = vmatpush3.msra.mxu0 %v814_v40 }
 0x37a   :  { %1486 = vmatprep.subr.mxu0 %v813_v41 }
 0x37b   :  { %1487 = vmatpush3.msra.mxu0 %v813_v41 }
 0x37c   :  { %1488 = vmatprep.subr.mxu0 %v812_v42 }
 0x37d   :  { %1489 = vmatpush3.msra.mxu0 %v812_v42 }
 0x37e   :  { %1490 = vmatprep.subr.mxu0 %v811_v43 }
 0x37f   :  { %1491 = vmatpush3.msra.mxu0 %v811_v43 }
 0x380   :  { %1492 = vmatprep.subr.mxu0 %v810_v44 }
 0x381   :  { %1493 = vmatpush3.msra.mxu0 %v810_v44 }
 0x382   :  { %1494 = vmatprep.subr.mxu0 %v809_v45 }
 0x383   :  { %1495 = vmatpush3.msra.mxu0 %v809_v45 }
 0x384   :  { %1496 = vmatprep.subr.mxu0 %v808_v46 }
 0x385   :  { %1497 = vmatpush3.msra.mxu0 %v808_v46 }
 0x386   :  { %1498 = vmatprep.subr.mxu0 %v807_v47 }
 0x387   :  { %1499 = vmatpush3.msra.mxu0 %v807_v47 }
 0x425   :  { %v1450_v9 = vpop.f32.mrf.mxu1  ;;  %v1464_v10 = vpop.f32.mrf.mxu0 }
 0x426   :  { %v749_v12 = vadd.f32 %v1464_v10, %v1450_v9  ;;  %v1218_v10 = vsel %vm912_vm3, 1.0, %v1680_v25 }
 0x427   :  { %v646_v13 = vpop.f32.mrf.mxu1  ;;  %v743_v14 = vpop.f32.mrf.mxu0 }
 0x428   :  { %v1833_v16 = vadd.f32 %v763_v11, %v749_v12  ;;  %v744_v17 = vadd.f32 %v743_v14, %v646_v13 }
 0x429   :  { %v1453_v18 = vpop.f32.mrf.mxu1  ;;  %v1467_v19 = vpop.f32.mrf.mxu0 }
 0x42a   :  { %v1836_v21 = vadd.f32 %v762_v15, %v744_v17  ;;  %v759_v23 = vadd.f32 %v1467_v19, %v1453_v18  ;;  %v771_v24 = vmul.f32 %v1833_v16, %v1833_v16  ;;  %v1217_v17 = vsel %vm908_vm5, 1.0, %v1680_v25  ;;  %v930_v18 = vld [vmem:[#allocation8 + $0x48] sm:$0xff] }
 0x42b   :  { %v656_v27 = vpop.f32.mrf.mxu1  ;;  %v753_v28 = vpop.f32.mrf.mxu0 }
 0x42c   :  { %v1842_v30 = vadd.f32 %v765_v20, %v759_v23  ;;  %v754_v31 = vadd.f32 %v753_v28, %v656_v27  ;;  %776 = vadd.xlane.f32.xlu1 %v771_v24  ;;  %v770_v32 = vmul.f32 %v1836_v21, %v1836_v21  ;;  %v931_v20 = vld [vmem:[#allocation8 + $0x50] sm:$0xff]  ;;  %v932_v23 = vld [vmem:[#allocation8 + $0x58] sm:$0xff]  ;;  %v920_v27 = vld [vmem:[#allocation7 + $0x40] sm:$0xff] }
 0x42e   :  { %v1846_v34 = vadd.f32 %v764_v29, %v754_v31  ;;  %774 = vadd.xlane.f32.xlu0 %v770_v32  ;;  %v773_v35 = vmul.f32 %v1842_v30, %v1842_v30  ;;  %v921_v29 = vld [vmem:[#allocation7 + $0x48] sm:$0xff]  ;;  %v923_v31 = vld [vmem:[#allocation7 + $0x58] sm:$0xff] }
 0x430   :  { %780 = vadd.xlane.f32.xlu1 %v773_v35  ;;  %v772_v36 = vmul.f32 %v1846_v34, %v1846_v34 }
 0x432   :  { %778 = vadd.xlane.f32.xlu0 %v772_v36  ;;  %v1219_v36 = vsel %vm916_vm6, 1.0, %v1680_v25 }
 0x4b5   :  { %v777_v48 = vpop.xlane.xlu1 %776 }
 0x4b6   :  { %v783_v49 = vmax.f32 %v777_v48, 1e-24 }
 0x4b7   :  { %v775_v50 = vpop.xlane.xlu0 %774 }
 0x4b8   :  { %1550 = vrsqrt.f32 %v783_v49  ;;  %v782_v51 = vmax.f32 %v775_v50, 1e-24 }
 0x4b9   :  { %v781_v52 = vpop.xlane.xlu1 %780 }
 0x4ba   :  { %1552 = vrsqrt.f32 %v782_v51  ;;  %v785_v53 = vmax.f32 %v781_v52, 1e-24 }
 0x4bb   :  { %v779_v55 = vpop.xlane.xlu0 %778 }
 0x4bc   :  { %1554 = vrsqrt.f32 %v785_v53  ;;  %v784_v56 = vmax.f32 %v779_v55, 1e-24 }
 0x4be   :  { %1556 = vrsqrt.f32 %v784_v56 }
 0x4c5   :  { %v1551_v57 = vpop.eup %1550 }
 0x4c6   :  { %v791_v58 = vmul.f32 %v1551_v57, %v1833_v16 }
 0x4c7   :  { %v1553_v59 = vpop.eup %1552 }
 0x4c8   :  { %v790_v60 = vmul.f32 %v1553_v59, %v1836_v21  ;;  %v799_v62 = vmul.f32 0.1, %v791_v58  ;;  %vm795_vm13 = vcmp.ge.f32.partialorder %v791_v58, 0.0 }
 0x4c9   :  { %v1555_v61 = vpop.eup %1554 }
 0x4ca   :  { %vm794_vm12 = vcmp.ge.f32.partialorder %v790_v60, 0.0  ;;  %v798_v63 = vmul.f32 0.1, %v790_v60  ;;  %v793_v0 = vmul.f32 %v1555_v61, %v1842_v30  ;;  %v803_v4 = vsel %vm795_vm13, %v791_v58, %v799_v62  ;;  %v922_v30 = vld [vmem:[#allocation7 + $0x50] sm:$0xff] }
 0x4cb   :  { %v1557_v1 = vpop.eup %1556 }
 0x4cc   :  { %v802_v2 = vsel %vm794_vm12, %v790_v60, %v798_v63  ;;  %v792_v3 = vmul.f32 %v1557_v1, %v1846_v34  ;;  %v801_v26 = vmul.f32 0.1, %v793_v0  ;;  %vm797_vm15 = vcmp.ge.f32.partialorder %v793_v0, 0.0 }
 0x4cd   :  { %1500 = vmatprep.mubr.f32.mxu0 %v802_v2 }
 0x4ce   :  { %1501 = vmatmul.mubr.f32.vlgmr.msra.gmra.mxu0 %v803_v4  ;;  %vm796_vm14 = vcmp.ge.f32.partialorder %v792_v3, 0.0  ;;  %v800_v33 = vmul.f32 0.1, %v792_v3  ;;  %v805_v6 = vsel %vm797_vm15, %v793_v0, %v801_v26 }
 0x4d0   :  { %v804_v5 = vsel %vm796_vm14, %v792_v3, %v800_v33 }
 0x4d1   :  { %1503 = vmatprep.mubr.f32.mxu0 %v804_v5 }
 0x4d2   :  { %1504 = vmatmul.mubr.f32.gmra.mxu0 %v805_v6 }
 0x58e   :  { %v1502_v8 = vpop.f32.mrf.mxu0 }
 0x58f   :  { %v934_v15 = vmul.f32 %v1502_v8, %v1218_v10  ;;  %v925_v24 = vmul.f32 %v1502_v8, %v1217_v17  ;;  %v1132_v38 = vmul.f32 %v1502_v8, %v1219_v36 }
 0x590   :  { %v889_v9 = vpop.f32.mrf.mxu0 }
 0x591   :  { %v933_v16 = vmul.f32 %v1218_v10, %v889_v9  ;;  %v924_v28 = vmul.f32 %v1217_v17, %v889_v9  ;;  %v1131_v41 = vmul.f32 %v1219_v36, %v889_v9 }
 0x592   :  { %v1505_v11 = vpop.f32.mrf.mxu0 }
 0x593   :  { %v936_v12 = vmul.f32 %v1505_v11, %v1218_v10  ;;  %v927_v19 = vmul.f32 %v1505_v11, %v1217_v17  ;;  %v1134_v45 = vmul.f32 %v1505_v11, %v1219_v36 }
 0x594   :  { %v899_v13 = vpop.f32.mrf.mxu0 }
 0x595   :  { %v935_v14 = vmul.f32 %v1218_v10, %v899_v13  ;;  %1506 = vmatprep.subr.mxu1 %v936_v12  ;;  %v926_v21 = vmul.f32 %v1217_v17, %v899_v13  ;;  %v1133_v50 = vmul.f32 %v1219_v36, %v899_v13 }
 0x596   :  { %1507 = vmatpush3.msra.mxu1 %v936_v12 }
 0x597   :  { %1508 = vmatprep.subr.mxu1 %v935_v14 }
 0x598   :  { %1509 = vmatpush3.msra.mxu1 %v935_v14 }
 0x599   :  { %1510 = vmatprep.subr.mxu1 %v934_v15 }
 0x59a   :  { %1511 = vmatpush3.msra.mxu1 %v934_v15 }
 0x59b   :  { %1512 = vmatprep.subr.mxu1 %v933_v16 }
 0x59c   :  { %1513 = vmatpush3.msra.mxu1 %v933_v16 }
 0x59d   :  { %1515 = vmatmul.mubr.msk.f32.vlgmr.msra.gmra.mxu1 %vm209_vm0, %v930_v18  ;;  %1520 = vmatprep.subr.mxu1 %v927_v19 }
 0x59e   :  { %1521 = vmatpush3.msra.mxu1 %v927_v19  ;;  %1517 = vmatprep.mubr.msk.f32.mxu1 %vm209_vm0, %v931_v20 }
 0x59f   :  { %1522 = vmatprep.subr.mxu1 %v926_v21 }
 0x5a0   :  { %1523 = vmatpush3.msra.mxu1 %v926_v21 }
 0x5a1   :  { %1518 = vmatmul.mubr.msk.f32.gmra.mxu1 %vm209_vm0, %v932_v23  ;;  %1524 = vmatprep.subr.mxu1 %v925_v24 }
 0x5a2   :  { %1525 = vmatpush3.msra.mxu1 %v925_v24  ;;  %1528 = vmatprep.mubr.msk.f32.mxu1 %vm209_vm0, %v920_v27 }
 0x5a3   :  { %1526 = vmatprep.subr.mxu1 %v924_v28 }
 0x5a4   :  { %1527 = vmatpush3.msra.mxu1 %v924_v28 }
 0x5a5   :  { %1529 = vmatmul.mubr.msk.f32.vlgmr.msra.gmra.mxu1 %vm209_vm0, %v921_v29 }
 0x5a6   :  { %1531 = vmatprep.mubr.msk.f32.mxu1 %vm209_vm0, %v922_v30 }
 0x5a9   :  { %1532 = vmatmul.mubr.msk.f32.gmra.mxu1 %vm209_vm0, %v923_v31 }
 0x65d   :  { %v1516_v32 = vpop.f32.mrf.mxu1 }
 0x65f   :  { %v1015_v34 = vpop.f32.mrf.mxu1 }
 0x661   :  { %v1519_v35 = vpop.f32.mrf.mxu1 }
 0x663   :  { %v1025_v37 = vpop.f32.mrf.mxu1 }
 0x665   :  { %v1530_v54 = vpop.f32.mrf.mxu1 }
 0x666   :  { %v1118_v39 = vadd.f32 %v1530_v54, %v1516_v32 }
 0x667   :  { %v1112_v40 = vpop.f32.mrf.mxu1 }
 0x668   :  { %v1136_v42 = vadd.f32 %v1132_v38, %v1118_v39  ;;  %v1113_v43 = vadd.f32 %v1112_v40, %v1015_v34 }
 0x669   :  { %v1533_v44 = vpop.f32.mrf.mxu1 }
 0x66a   :  { %v1135_v46 = vadd.f32 %v1131_v41, %v1113_v43  ;;  %v1128_v47 = vadd.f32 %v1533_v44, %v1519_v35  ;;  %v1140_v48 = vmul.f32 %v1136_v42, %v1136_v42 }
 0x66b   :  { %v1122_v49 = vpop.f32.mrf.mxu1 }
 0x66c   :  { %v1138_v22 = vadd.f32 %v1134_v45, %v1128_v47  ;;  %v1123_v51 = vadd.f32 %v1122_v49, %v1025_v37  ;;  %1145 = vadd.xlane.f32.xlu1 %v1140_v48  ;;  %v1139_v52 = vmul.f32 %v1135_v46, %v1135_v46 }
 0x66e   :  { %v1137_v25 = vadd.f32 %v1133_v50, %v1123_v51  ;;  %1143 = vadd.xlane.f32.xlu0 %v1139_v52  ;;  %v1142_v53 = vmul.f32 %v1138_v22, %v1138_v22 }
 0x670   :  { %1149 = vadd.xlane.f32.xlu1 %v1142_v53  ;;  %v1141_v55 = vmul.f32 %v1137_v25, %v1137_v25 }
 0x672   :  { %1147 = vadd.xlane.f32.xlu0 %v1141_v55 }
 0x6f5   :  { %v1146_v56 = vpop.xlane.xlu1 %1145 }
 0x6f6   :  { %v1152_v57 = vmax.f32 %v1146_v56, 1e-24 }
 0x6f7   :  { %v1144_v58 = vpop.xlane.xlu0 %1143 }
 0x6f8   :  { %1558 = vrsqrt.f32 %v1152_v57  ;;  %v1151_v59 = vmax.f32 %v1144_v58, 1e-24 }
 0x6f9   :  { %v1150_v60 = vpop.xlane.xlu1 %1149 }
 0x6fa   :  { %1560 = vrsqrt.f32 %v1151_v59  ;;  %v1154_v61 = vmax.f32 %v1150_v60, 1e-24 }
 0x6fb   :  { %v1148_v62 = vpop.xlane.xlu0 %1147 }
 0x6fc   :  { %1562 = vrsqrt.f32 %v1154_v61  ;;  %v1153_v63 = vmax.f32 %v1148_v62, 1e-24 }
 0x6fe   :  { %1564 = vrsqrt.f32 %v1153_v63 }
 0x705   :  { %v1559_v0 = vpop.eup %1558 }
 0x706   :  { %v1160_v1 = vmul.f32 %v1559_v0, %v1136_v42 }
 0x707   :  { %v1561_v2 = vpop.eup %1560 }
 0x708   :  { %v1159_v3 = vmul.f32 %v1561_v2, %v1135_v46  ;;  %vm1164_vm0 = vcmp.ge.f32.partialorder %v1160_v1, 0.0  ;;  %v1168_v4 = vmul.f32 0.1, %v1160_v1 }
 0x709   :  { %v1563_v26 = vpop.eup %1562 }
 0x70a   :  { %v1162_v33 = vmul.f32 %v1563_v26, %v1138_v22  ;;  %vm1163_vm1 = vcmp.ge.f32.partialorder %v1159_v3, 0.0  ;;  %v1167_v5 = vmul.f32 0.1, %v1159_v3  ;;  %v1172_v6 = vsel %vm1164_vm0, %v1160_v1, %v1168_v4 }
 0x70b   :  { %v1565_v7 = vpop.eup %1564  ;;  %1176 = vst [vmem:[#allocation10 + $0x8] sm:$0xff] %v1172_v6 }
 0x70c   :  { %v1161_v8 = vmul.f32 %v1565_v7, %v1137_v25  ;;  %vm1166_vm7 = vcmp.ge.f32.partialorder %v1162_v33, 0.0  ;;  %v1170_v9 = vmul.f32 0.1, %v1162_v33  ;;  %v1171_v10 = vsel %vm1163_vm1, %v1159_v3, %v1167_v5 }
 0x70d   :  { %1175 = vst [vmem:[#allocation10] sm:$0xff] %v1171_v10 }
 0x70e   :  { %vm1165_vm8 = vcmp.ge.f32.partialorder %v1161_v8, 0.0  ;;  %v1169_v11 = vmul.f32 0.1, %v1161_v8  ;;  %v1174_v12 = vsel %vm1166_vm7, %v1162_v33, %v1170_v9 }
 0x70f   :  { %1178 = vst [vmem:[#allocation10 + $0x18] sm:$0xff] %v1174_v12 }
 0x710   :  { %v1173_v13 = vsel %vm1165_vm8, %v1161_v8, %v1169_v11 }
 0x711   :  { %1177 = vst [vmem:[#allocation10 + $0x10] sm:$0xff] %v1173_v13 }
 0x712   :  { %1657 = shalt.err (!%p1654_p10)
}
 0x713   :  { %1190 = dma.vmem_to_hbm [thread:$0]  %s1185_s3, 512, %s1884_s4, [#allocation4], %s1676_s20, %s1676_s20, %s1677_s21  }
 0x714   :  { %1672 = dma.done.wait [#allocation4], 512  }
 0x715   :  { %1673 = vsyncadd [#allocation4], 4294966784 }
 0x716   :  { %1194 = vsyncpa [#allocation3], 1 }
 0x717   :  { %1195 = vsyncpa [#allocation6], 1 }
 0x718   :  { %1196 = vsyncpa [#allocation9], 1 }
 0x719   :  { %1197 = vsyncpa [#allocation4], 1 }

</bundles_post_ra>
